<compile_context>
chip_gen: v7x
topology: tpu7x:2x2x1
jax: 0.10.0
libtpu: 0.0.40
codegen_flags: <defaults>
</compile_context>

<pallas_src>
import functools

import jax
import jax.numpy as jnp
from jax import lax
from jax.experimental import pallas as pl
from jax.experimental.pallas import tpu as pltpu

# MXU feed dtype.  bf16 inputs + fp32 accumulation is ~4-8x MXU throughput on
# v5e/v6e/v7x vs fp32 inputs.  Set to jnp.float32 for strict fp32 parity with
# nn.LSTM (the __main__ tolerances adapt automatically).
COMPUTE_DTYPE = jnp.bfloat16


# ---------------------------------------------------------------------------
# Generation-aware hardware queries
# ---------------------------------------------------------------------------
@functools.lru_cache(maxsize=None)
def _vmem_limit_bytes():
    """Scoped-VMEM budget: ~100 MiB on 128-MiB chips (v5e/v6e), ~50 MiB on v7x."""
    cap = 64 * 1024 * 1024
    try:
        cap = int(pltpu.get_tpu_info().vmem_capacity_bytes)
    except Exception:
        pass
    return max(32 * 1024 * 1024, min(int(cap * 0.78), 104 * 1024 * 1024))


@functools.lru_cache(maxsize=None)
def _num_tensorcores():
    """TensorCores per chip: split the parallel batch axis only where >1 TC exists."""
    try:
        info = pltpu.get_tpu_info()
        for attr in ("num_cores", "tensorcores_per_chip", "core_count"):
            v = getattr(info, attr, None)
            if v:
                return int(v)
    except Exception:
        pass
    try:
        return max(1, int(getattr(jax.devices()[0], "num_cores", 1) or 1))
    except Exception:
        return 1


# ---------------------------------------------------------------------------
# Tiling helpers
# ---------------------------------------------------------------------------
def _tile_and_pad(dim, target, mult):
    """Pick a block size (<= target) for `dim` and the padded extent.

    Returns (tile, padded_dim): tile divides padded_dim; tile is either the full
    dim (allowed regardless of alignment) or a multiple of `mult`.  Padding is
    preferred over one giant full-extent block so tiles stay VMEM-bounded and
    the pipeline stays 2-deep (perf review: padding instead of fallbacks).
    """
    if dim <= target:
        return dim, dim
    t_max = max(mult, (target // mult) * mult)
    best = 0
    t = t_max
    while t >= mult:
        if dim % t == 0:
            best = t
            break
        t -= mult
    if best * 2 >= t_max:                      # good divisor: no padding needed
        return best, dim
    padded = ((dim + t_max - 1) // t_max) * t_max
    return t_max, padded


def _pick_batch_block(batch):
    nc = _num_tensorcores()
    if nc > 1 and batch % nc == 0 and (batch // nc) % 8 == 0:
        return batch // nc        # feed both TensorCores (v7x) via the parallel axis
    return batch                  # single TC (v5e/v6e): don't shrink the matmul M dim


def _pick_time_block(seq, cap):
    """Largest time block <= cap; pad the sequence if no decent divisor exists."""
    cap = max(1, min(int(cap), seq))
    if seq % cap == 0:
        return cap, seq
    best = 1
    for t in range(cap, 0, -1):
        if seq % t == 0:
            best = t
            break
    if best * 2 >= cap:
        return best, seq
    return cap, ((seq + cap - 1) // cap) * cap


# ---------------------------------------------------------------------------
# Tiled matmul + bias:  out = a @ w + b   (K-tiled, fp32 accumulator)
# Used for the hoisted LSTM input projection and the fc layer.
# ---------------------------------------------------------------------------
def _matmul_bias_kernel(a_ref, w_ref, b_ref, o_ref, acc_ref, *, compute_dtype):
    k = pl.program_id(2)

    @pl.when(k == 0)
    def _():
        acc_ref[...] = jnp.zeros_like(acc_ref)

    acc_ref[...] += jnp.dot(a_ref[...].astype(compute_dtype),
                            w_ref[...].astype(compute_dtype),
                            preferred_element_type=jnp.float32)

    @pl.when(k == pl.num_programs(2) - 1)
    def _():
        o_ref[...] = (acc_ref[...] + b_ref[...].astype(jnp.float32)).astype(o_ref.dtype)


def matmul_bias(a, w, b, *, out_dtype=None, compute_dtype=None,
                tm_target=512, tn_target=1024, tk_target=512):
    """a: (M, K); w: (K, N); b: (1, N) -> (M, N)."""
    compute_dtype = compute_dtype or COMPUTE_DTYPE
    out_dtype = out_dtype or a.dtype
    M, K = a.shape
    N = w.shape[1]

    tm, Mp = _tile_and_pad(M, tm_target, 8)
    tn, Np = _tile_and_pad(N, tn_target, 128)
    tk, Kp = _tile_and_pad(K, tk_target, 128)

    # Weights are re-read once per M tile: pre-cast once to the MXU feed dtype
    # (halves weight HBM traffic + VMEM; no-op in strict fp32 mode).
    w = w.astype(compute_dtype)

    if (Mp, Kp) != (M, K):
        a = jnp.pad(a, ((0, Mp - M), (0, Kp - K)))
    if (Kp, Np) != (K, N):
        w = jnp.pad(w, ((0, Kp - K), (0, Np - N)))
    if Np != N:
        b = jnp.pad(b, ((0, 0), (0, Np - N)))

    grid = (Mp // tm, Np // tn, Kp // tk)
    cost = pl.CostEstimate(
        flops=int(2 * Mp * Kp * Np),
        transcendentals=0,
        bytes_accessed=int(a.size * a.dtype.itemsize
                           + (Mp // tm) * w.size * w.dtype.itemsize
                           + Mp * Np * jnp.dtype(out_dtype).itemsize))

    out = pl.pallas_call(
        functools.partial(_matmul_bias_kernel, compute_dtype=compute_dtype),
        out_shape=jax.ShapeDtypeStruct((Mp, Np), out_dtype),
        grid_spec=pltpu.PrefetchScalarGridSpec(
            num_scalar_prefetch=0,
            grid=grid,
            in_specs=[
                pl.BlockSpec((tm, tk), lambda i, j, k: (i, k)),
                pl.BlockSpec((tk, tn), lambda i, j, k: (k, j)),
                pl.BlockSpec((1, tn), lambda i, j, k: (0, j)),
            ],
            out_specs=pl.BlockSpec((tm, tn), lambda i, j, k: (i, j)),
            scratch_shapes=[pltpu.VMEM((tm, tn), jnp.float32)],
        ),
        compiler_params=pltpu.CompilerParams(
            dimension_semantics=("parallel", "parallel", "arbitrary"),
            vmem_limit_bytes=_vmem_limit_bytes()),
        cost_estimate=cost,
    )(a, w, b)

    if (Mp, Np) != (M, N):
        out = out[:M, :N]
    return out


# ---------------------------------------------------------------------------
# Recurrent LSTM kernel:  gates_t = xproj_t + h_prev @ W_hh^T
# (input projection already hoisted).  Time-major blocks; fp32 h/c carry.
# Gate order follows PyTorch nn.LSTM: i, f, g, o.
# ---------------------------------------------------------------------------
def _lstm_rec_kernel(xproj_ref, h0_ref, c0_ref, whh_ref,
                     hseq_ref, hn_ref, cn_ref, h_sc, c_sc,
                     *, seq_len, block_len, needs_mask, compute_dtype):
    # NOTE: the h_sc/c_sc carry requires the time axis to be the LAST
    # ("arbitrary", innermost) grid axis so that, for a fixed batch block, all
    # time blocks execute back-to-back on one core.  Do not reorder the grid.
    t_idx = pl.program_id(1)

    @pl.when(t_idx == 0)
    def _():
        h_sc[...] = h0_ref[...].astype(jnp.float32)
        c_sc[...] = c0_ref[...].astype(jnp.float32)

    H = h_sc.shape[-1]
    whh = whh_ref[...].astype(compute_dtype)       # grid-invariant; loaded once per step
    t0 = t_idx * block_len

    def step(i, carry):
        h_prev, c_prev = carry
        # Leading-axis slice -> whole (8,128) tiles: no sublane relayout on read,
        # no masked/strided partial store on write, inside the serial loop.
        gates = (xproj_ref[i].astype(jnp.float32)
                 + jnp.dot(h_prev.astype(compute_dtype), whh,
                           preferred_element_type=jnp.float32))
        # Gate slices are free view offsets when H is a multiple of 128.
        i_g = jax.nn.sigmoid(gates[:, 0 * H:1 * H])
        f_g = jax.nn.sigmoid(gates[:, 1 * H:2 * H])
        g_g = jnp.tanh(gates[:, 2 * H:3 * H])
        o_g = jax.nn.sigmoid(gates[:, 3 * H:4 * H])
        c_new = f_g * c_prev + i_g * g_g
        h_new = o_g * jnp.tanh(c_new)
        if needs_mask:                              # static: only when seq was padded
            valid = (t0 + i) < seq_len
            h_new = jnp.where(valid, h_new, h_prev)
            c_new = jnp.where(valid, c_new, c_prev)
        hseq_ref[i] = h_new.astype(hseq_ref.dtype)
        return h_new, c_new

    # Modest-unroll fori_loop instead of a wide static unroll: bounds live ranges
    # and vreg/spill pressure while keeping the MXU cadence visible.
    h_fin, c_fin = lax.fori_loop(0, block_len, step,
                                 (h_sc[...], c_sc[...]), unroll=2)
    h_sc[...] = h_fin
    c_sc[...] = c_fin

    @pl.when(t_idx == pl.num_programs(1) - 1)
    def _():
        hn_ref[...] = h_sc[...].astype(hn_ref.dtype)
        cn_ref[...] = c_sc[...].astype(cn_ref.dtype)


def lstm_recurrent(xproj, h0, c0, whh_t, *, hseq_dtype=None, compute_dtype=None):
    """xproj: (S, B, 4H) time-major, = x @ W_ih^T + (b_ih + b_hh) for every step;
    h0/c0: (B, H); whh_t: (H, 4H).
    Returns hseq (S, B, H) time-major, hn (B, H) fp32, cn (B, H) fp32."""
    compute_dtype = compute_dtype or COMPUTE_DTYPE
    S, B, G = xproj.shape
    H = h0.shape[-1]
    hseq_dtype = hseq_dtype or xproj.dtype
    vmem_limit = _vmem_limit_bytes()

    bb = _pick_batch_block(B)
    # Size the time block from an explicit VMEM budget (generation-aware):
    # double-buffered xproj + hseq blocks + W_hh (worst-case double-buffered)
    # + h0/c0/hn/cn blocks + fp32 carries must fit.
    per_t = 2 * bb * (G * jnp.dtype(xproj.dtype).itemsize
                      + H * jnp.dtype(hseq_dtype).itemsize)
    fixed = (2 * H * G * jnp.dtype(whh_t.dtype).itemsize
             + 10 * bb * H * 4)
    budget = int(vmem_limit * 0.7)
    cap = max(1, (budget - fixed) // per_t) if budget > fixed else 1
    tb, S_pad = _pick_time_block(S, min(cap, 64))
    if S_pad != S:
        xproj = jnp.pad(xproj, ((0, S_pad - S), (0, 0), (0, 0)))

    grid = (B // bb, S_pad // tb)
    out_shapes = (
        jax.ShapeDtypeStruct((S_pad, B, H), hseq_dtype),
        jax.ShapeDtypeStruct((B, H), jnp.float32),
        jax.ShapeDtypeStruct((B, H), jnp.float32),
    )
    kernel = functools.partial(
        _lstm_rec_kernel, seq_len=S, block_len=tb,
        needs_mask=(S_pad != S), compute_dtype=compute_dtype)
    cost = pl.CostEstimate(
        flops=int(2 * B * S_pad * H * G),
        transcendentals=int(5 * B * S_pad * H),
        bytes_accessed=int(xproj.size * xproj.dtype.itemsize
                           + S_pad * B * H * jnp.dtype(hseq_dtype).itemsize
                           + (B // bb) * whh_t.size * whh_t.dtype.itemsize))

    def call(single_buffer_invariants):
        inv = dict(pipeline_mode=pl.Buffered(1)) if single_buffer_invariants else {}
        grid_spec = pltpu.PrefetchScalarGridSpec(
            num_scalar_prefetch=0,
            grid=grid,
            in_specs=[
                pl.BlockSpec((tb, bb, G), lambda b, t: (t, b, 0)),   # xproj block
                pl.BlockSpec((bb, H), lambda b, t: (b, 0), **inv),   # h0 (grid-invariant in t)
                pl.BlockSpec((bb, H), lambda b, t: (b, 0), **inv),   # c0
                pl.BlockSpec((H, G), lambda b, t: (0, 0), **inv),    # W_hh^T (grid-invariant)
            ],
            out_specs=[
                pl.BlockSpec((tb, bb, H), lambda b, t: (t, b, 0)),   # h sequence
                pl.BlockSpec((bb, H), lambda b, t: (b, 0)),          # h_n
                pl.BlockSpec((bb, H), lambda b, t: (b, 0)),          # c_n
            ],
            scratch_shapes=[pltpu.VMEM((bb, H), jnp.float32),        # h carry (fp32)
                            pltpu.VMEM((bb, H), jnp.float32)],       # c carry (fp32)
        )
        return pl.pallas_call(
            kernel,
            grid_spec=grid_spec,
            out_shape=out_shapes,
            compiler_params=pltpu.CompilerParams(
                dimension_semantics=("parallel", "arbitrary"),
                vmem_limit_bytes=vmem_limit),
            cost_estimate=cost,
        )(xproj, h0, c0, whh_t)

    try:
        # Single-buffer the grid-invariant operands (halves W_hh VMEM residency).
        hseq, hn, cn = call(True)
    except Exception:
        # pipeline_mode / Buffered(1) unsupported on this jax: default buffering.
        hseq, hn, cn = call(False)

    if S_pad != S:
        hseq = hseq[:S]
    return hseq, hn, cn


# ---------------------------------------------------------------------------
# Model: parameters + forward
# ---------------------------------------------------------------------------
def init_params(key, vocab_size, hidden_size, num_layers):
    k = 1.0 / jnp.sqrt(jnp.float32(hidden_size))
    params = {"lstm": []}
    keys = jax.random.split(key, 4 * num_layers + 2)
    for l in range(num_layers):
        in_feat = vocab_size if l == 0 else hidden_size
        kw = keys[4 * l: 4 * l + 4]
        w_ih = jax.random.uniform(kw[0], (4 * hidden_size, in_feat), jnp.float32, -k, k)
        w_hh = jax.random.uniform(kw[1], (4 * hidden_size, hidden_size), jnp.float32, -k, k)
        b_ih = jax.random.uniform(kw[2], (4 * hidden_size,), jnp.float32, -k, k)
        b_hh = jax.random.uniform(kw[3], (4 * hidden_size,), jnp.float32, -k, k)
        params["lstm"].append(dict(
            wih_t=w_ih.T,                       # (in_feat, 4H)
            whh_t=w_hh.T,                       # (hidden, 4H)
            bias=(b_ih + b_hh)[None, :],        # (1, 4H)
        ))
    fc_w = jax.random.uniform(keys[-2], (vocab_size, hidden_size), jnp.float32, -k, k)
    fc_b = jax.random.uniform(keys[-1], (vocab_size,), jnp.float32, -k, k)
    params["fc_w_t"] = fc_w.T                   # (hidden, vocab)
    params["fc_b"] = fc_b[None, :]              # (1, vocab)
    return params


def init_hidden(batch_size, hidden_size, num_layers):
    return (jnp.zeros((num_layers, batch_size, hidden_size), jnp.float32),
            jnp.zeros((num_layers, batch_size, hidden_size), jnp.float32))


def text_generation_forward(params, x, hidden):
    """x: (batch, seq, vocab) [batch_first=True].  hidden: (num_layers, batch, H) x2."""
    h0_all, c0_all = hidden
    num_layers = h0_all.shape[0]
    B, S, V = x.shape
    H = h0_all.shape[-1]

    # Time-major layout for the whole pipeline; only the model input and the
    # final logits cross the batch-major <-> time-major boundary.
    # TODO(synk): fold these two boundary transposes into the layer-0 projection
    # in_spec / fc out_spec to save one HBM pass each on x and on the logits.
    acts = jnp.transpose(x, (1, 0, 2))                      # (S, B, feat)

    hn_list, cn_list = [], []
    for l in range(num_layers):
        p = params["lstm"][l]
        in_feat = acts.shape[-1]
        # Hoisted, time-independent input projection: one K-tiled matmul; the
        # intermediate is stored in the compute dtype (bf16) to halve its HBM
        # round trip.
        # TODO(synk): for layers >= 1 (in_feat == H) fuse this projection into
        # the recurrent kernel to avoid materializing xproj in HBM at all.
        xproj = matmul_bias(acts.reshape(S * B, in_feat), p["wih_t"], p["bias"],
                            out_dtype=COMPUTE_DTYPE)
        xproj = xproj.reshape(S, B, 4 * H)
        # Serial recurrence: only h @ W_hh^T per step.
        acts, hn, cn = lstm_recurrent(
            xproj, h0_all[l], c0_all[l], p["whh_t"].astype(COMPUTE_DTYPE),
            hseq_dtype=COMPUTE_DTYPE)
        hn_list.append(hn)
        cn_list.append(cn)

    logits = matmul_bias(acts.reshape(S * B, H), params["fc_w_t"], params["fc_b"],
                         out_dtype=jnp.float32)
    out = jnp.transpose(logits.reshape(S, B, -1), (1, 0, 2))    # (batch, seq, vocab)
    return out, (jnp.stack(hn_list), jnp.stack(cn_list))


# ---------------------------------------------------------------------------
# Pure-JAX fp32 reference (correctness sanity check only)
# ---------------------------------------------------------------------------
def reference_forward(params, x, hidden):
    h0_all, c0_all = hidden
    num_layers = h0_all.shape[0]
    xs = jnp.transpose(x, (1, 0, 2))
    hn_list, cn_list = [], []
    for l in range(num_layers):
        p = params["lstm"][l]
        H = h0_all.shape[-1]

        def step(carry, x_t, p=p, H=H):
            h, c = carry
            gates = x_t @ p["wih_t"] + h @ p["whh_t"] + p["bias"]
            i = jax.nn.sigmoid(gates[:, :H])
            f = jax.nn.sigmoid(gates[:, H:2 * H])
            g = jnp.tanh(gates[:, 2 * H:3 * H])
            o = jax.nn.sigmoid(gates[:, 3 * H:])
            c_new = f * c + i * g
            h_new = o * jnp.tanh(c_new)
            return (h_new, c_new), h_new

        (hn, cn), hs = jax.lax.scan(step, (h0_all[l], c0_all[l]), xs)
        xs = hs
        hn_list.append(hn)
        cn_list.append(cn)
    out = xs @ params["fc_w_t"] + params["fc_b"]
    return jnp.transpose(out, (1, 0, 2)), (jnp.stack(hn_list), jnp.stack(cn_list))


if __name__ == "__main__":
    vocab_size, hidden_size = 32, 32
    batch, seq = 2, 8

    # bf16-fed MXU (fp32 accumulation) deviates slightly from the fp32 reference.
    loose = COMPUTE_DTYPE != jnp.float32
    atol = 7e-2 if loose else 1e-4
    rtol = 7e-2 if loose else 1e-4

    for num_layers in (1, 2):
        key = jax.random.PRNGKey(0)
        kp, kx = jax.random.split(key)
        params = init_params(kp, vocab_size, hidden_size, num_layers)
        x = jax.random.normal(kx, (batch, seq, vocab_size), jnp.float32)
        hidden = init_hidden(batch, hidden_size, num_layers)

        out, (hn, cn) = text_generation_forward(params, x, hidden)
        jax.block_until_ready((out, hn, cn))

        out_ref, (hn_ref, cn_ref) = reference_forward(params, x, hidden)
        assert out.shape == (batch, seq, vocab_size)
        assert hn.shape == (num_layers, batch, hidden_size)
        assert cn.shape == (num_layers, batch, hidden_size)
        assert jnp.allclose(out, out_ref, atol=atol, rtol=rtol), (
            f"out mismatch, max abs err {jnp.max(jnp.abs(out - out_ref))}")
        assert jnp.allclose(hn, hn_ref, atol=atol, rtol=rtol), (
            f"hn mismatch, max abs err {jnp.max(jnp.abs(hn - hn_ref))}")
        assert jnp.allclose(cn, cn_ref, atol=atol, rtol=rtol), (
            f"cn mismatch, max abs err {jnp.max(jnp.abs(cn - cn_ref))}")

    print("KERNEL_OK")
</pallas_src>

<mosaic_0001>
module attributes {stable_mosaic.version = 11 : i64} {
  func.func @_matmul_bias_kernel(%arg0: i32, %arg1: i32, %arg2: i32, %arg3: memref<16x32xf32, #tpu.memory_space<vmem>>, %arg4: memref<32x128xbf16, #tpu.memory_space<vmem>>, %arg5: memref<1x128xf32, #tpu.memory_space<vmem>>, %arg6: memref<16x128xbf16, #tpu.memory_space<vmem>>, %arg7: memref<16x128xf32, #tpu.memory_space<vmem>>) attributes {dimension_semantics = [#tpu.dimension_semantics<parallel>, #tpu.dimension_semantics<parallel>, #tpu.dimension_semantics<arbitrary>], iteration_bounds = array<i64: 1, 1, 1>, scalar_prefetch = 0 : i64, scratch_operands = 1 : i64, tpu.core_type = #tpu.core_type<tc>, window_params = [{transform_indices = @transform_0, window_bounds = array<i64: 16, 32>}, {transform_indices = @transform_1, window_bounds = array<i64: 32, 128>}, {transform_indices = @transform_2, window_bounds = array<i64: 1, 128>}, {transform_indices = @transform_3, window_bounds = array<i64: 16, 128>}]} {
    %c0_i32 = arith.constant 0 : i32
    %0 = arith.cmpi eq, %arg2, %c0_i32 : i32
    %1 = arith.extui %0 : i1 to i32
    %c0_i32_0 = arith.constant 0 : i32
    %2 = arith.cmpi ne, %1, %c0_i32_0 : i32
    scf.if %2 {
      %cst_10 = arith.constant 0.000000e+00 : f32
      %13 = vector.broadcast %cst_10 : f32 to vector<16x128xf32>
      %c0_11 = arith.constant 0 : index
      %c0_12 = arith.constant 0 : index
      %14 = vector.load %arg7[%c0_11, %c0_12] : memref<16x128xf32, #tpu.memory_space<vmem>>, vector<16x128xf32>
      tpu.vector_store %arg7[%c0_11, %c0_12], %13 {strides = array<i32>} : memref<16x128xf32, #tpu.memory_space<vmem>>, vector<16x128xf32>,
    } else {
    }
    %c0 = arith.constant 0 : index
    %c0_1 = arith.constant 0 : index
    %3 = vector.load %arg7[%c0, %c0_1] : memref<16x128xf32, #tpu.memory_space<vmem>>, vector<16x128xf32>
    %c0_2 = arith.constant 0 : index
    %c0_3 = arith.constant 0 : index
    %4 = vector.load %arg3[%c0_2, %c0_3] : memref<16x32xf32, #tpu.memory_space<vmem>>, vector<16x32xf32>
    %5 = arith.truncf %4 : vector<16x32xf32> to vector<16x32xbf16>
    %c0_4 = arith.constant 0 : index
    %c0_5 = arith.constant 0 : index
    %6 = vector.load %arg4[%c0_4, %c0_5] : memref<32x128xbf16, #tpu.memory_space<vmem>>, vector<32x128xbf16>
    %cst = arith.constant dense<0.000000e+00> : vector<16x128xf32>
    %7 = tpu.matmul %5, %6, %cst {dimension_numbers = #tpu.dot_dimension_numbers<[1], [0], [0], [1], [0, 0, 1, 1], [], []>} : vector<16x32xbf16>, vector<32x128xbf16>, vector<16x128xf32> -> vector<16x128xf32>
    %8 = arith.addf %3, %7 : vector<16x128xf32>
    %c0_6 = arith.constant 0 : index
    %c0_7 = arith.constant 0 : index
    %9 = vector.load %arg7[%c0_6, %c0_7] : memref<16x128xf32, #tpu.memory_space<vmem>>, vector<16x128xf32>
    tpu.vector_store %arg7[%c0_6, %c0_7], %8 {strides = array<i32>} : memref<16x128xf32, #tpu.memory_space<vmem>>, vector<16x128xf32>,
    %c0_i32_8 = arith.constant 0 : i32
    %10 = arith.cmpi eq, %arg2, %c0_i32_8 : i32
    %11 = arith.extui %10 : i1 to i32
    %c0_i32_9 = arith.constant 0 : i32
    %12 = arith.cmpi ne, %11, %c0_i32_9 : i32
    scf.if %12 {
      %c0_10 = arith.constant 0 : index
      %c0_11 = arith.constant 0 : index
      %13 = vector.load %arg7[%c0_10, %c0_11] : memref<16x128xf32, #tpu.memory_space<vmem>>, vector<16x128xf32>
      %c0_12 = arith.constant 0 : index
      %c0_13 = arith.constant 0 : index
      %14 = vector.load %arg5[%c0_12, %c0_13] : memref<1x128xf32, #tpu.memory_space<vmem>>, vector<1x128xf32>
      %15 = vector.broadcast %14 : vector<1x128xf32> to vector<16x128xf32>
      %16 = arith.addf %13, %15 : vector<16x128xf32>
      %17 = arith.truncf %16 : vector<16x128xf32> to vector<16x128xbf16>
      %c0_14 = arith.constant 0 : index
      %c0_15 = arith.constant 0 : index
      %18 = vector.load %arg6[%c0_14, %c0_15] : memref<16x128xbf16, #tpu.memory_space<vmem>>, vector<16x128xbf16>
      tpu.vector_store %arg6[%c0_14, %c0_15], %17 {strides = array<i32>} : memref<16x128xbf16, #tpu.memory_space<vmem>>, vector<16x128xbf16>,
    } else {
    }
    return
  }
  func.func @transform_0(%arg0: i32, %arg1: i32, %arg2: i32) -> (i32, i32) {
    %c0_i32 = arith.constant 0 : i32
    return %arg0, %arg2 : i32, i32
  }
  func.func @transform_1(%arg0: i32, %arg1: i32, %arg2: i32) -> (i32, i32) {
    %c0_i32 = arith.constant 0 : i32
    return %arg2, %arg1 : i32, i32
  }
  func.func @transform_2(%arg0: i32, %arg1: i32, %arg2: i32) -> (i32, i32) {
    %c0_i32 = arith.constant 0 : i32
    %c0_i32_0 = arith.constant 0 : i32
    return %c0_i32, %arg1 : i32, i32
  }
  func.func @transform_3(%arg0: i32, %arg1: i32, %arg2: i32) -> (i32, i32) {
    %c0_i32 = arith.constant 0 : i32
    return %arg0, %arg1 : i32, i32
  }
}

</mosaic_0001>

<bundles_post_ra>
// kernel: tpu_custom_call.1
= control target key start
LH: loop header
LB: loop body
LE: loop exit
PB: predicated region body
PF: predicated region fallthrough
CT: control target
= control target key end

     0   :  { %8 = vsyncpa [#allocation4], 0  ;;  %s343_s0 = inlined_call_operand.hbm [shape: f32[16,32], index: 0, kind: input, shape index: {}]   ;;  %s344_s1 = inlined_call_operand.hbm [shape: bf16[32,128], index: 1, kind: input, shape index: {}]   ;;  %s345_s2 = inlined_call_operand.vmem [shape: f32[1,128], index: 2, kind: input, shape index: {}]   ;;  %s346_s3 = inlined_call_operand.hbm [shape: bf16[16,128], index: 3, kind: output, shape index: {}]  }
   0x1   :  { %9 = vsyncpa [#allocation7], 0 }
   0x2   :  { %10 = vsyncpa [#allocation5], 0  ;;  %s269_s12 = smov [#allocation3]   ;;  %s197_s16 = scalar_lea.hbm %s343_s0, 256 }
   0x3   :  { %s16_s13 = sshll.u32 %s269_s12, 4  ;;  %p198_p0 = scmp.ne.s32.totalorder %s343_s0, %s197_s16  ;;  %s17_s13 = int_to_ptr.vmem [resolvable:$true] %s16_s13 }
   0x4   :  { %p201_p1 = scmp.lt.u32.totalorder %s197_s16, %s343_s0 }
   0x6   :  { %p203_p2 = pnand %p201_p1, %p198_p0 }
   0x8   :  { %206 = shalt.err (!%p203_p2)
}
   0x9   :  { %s207_s21 = scalar_lea.vmem %s17_s13, 256  ;;  %p212_p4 = scmp.lt.s32.totalorder %s17_s13, %s17_s13 }
   0xa   :  { %p208_p3 = scmp.ne.s32.totalorder %s17_s13, %s207_s21  ;;  %p213_p5 = scmp.lt.s32.totalorder %s207_s21, %s207_s21 }
   0xc   :  { %p214_p6 = por %p213_p5, %p212_p4 }
   0xe   :  { %p215_p7 = pnand %p214_p6, %p208_p3 }
  0x10   :  { %218 = shalt.err (!%p215_p7)
}
  0x11   :  { %s270_s22 = smov 128   ;;  %s271_s23 = smov 8  }
  0x12   :  { %22 = dma.hbm_to_vmem [thread:$0]  %s343_s0, 256, %s17_s13, [#allocation4], %s270_s22, %s270_s22, %s271_s23  }
  0x13   :  { %s272_s26 = smov [#allocation6]   ;;  %s219_s30 = scalar_lea.hbm %s344_s1, 256 }
  0x14   :  { %s28_s27 = sshll.u32 %s272_s26, 4  ;;  %p220_p8 = scmp.ne.s32.totalorder %s344_s1, %s219_s30  ;;  %s29_s27 = int_to_ptr.vmem [resolvable:$true] %s28_s27 }
  0x15   :  { %p223_p9 = scmp.lt.u32.totalorder %s219_s30, %s344_s1 }
  0x17   :  { %p225_p10 = pnand %p223_p9, %p220_p8 }
  0x19   :  { %228 = shalt.err (!%p225_p10)
}
  0x1a   :  { %s229_s8 = scalar_lea.vmem %s29_s27, 256  ;;  %p234_p12 = scmp.lt.s32.totalorder %s29_s27, %s29_s27 }
  0x1b   :  { %p230_p11 = scmp.ne.s32.totalorder %s29_s27, %s229_s8  ;;  %p235_p13 = scmp.lt.s32.totalorder %s229_s8, %s229_s8 }
  0x1d   :  { %p236_p0 = por %p235_p13, %p234_p12 }
  0x1f   :  { %p237_p1 = pnand %p236_p0, %p230_p11 }
  0x21   :  { %240 = shalt.err (!%p237_p1)
}
  0x22   :  { %s273_s0 = smov 64   ;;  %s274_s9 = smov 4  }
  0x23   :  { %34 = dma.hbm_to_vmem [thread:$0]  %s344_s1, 256, %s29_s27, [#allocation7], %s273_s0, %s273_s0, %s274_s9  }
  0x24   :  { %263 = dma.done.wait [#allocation4], 256  }
  0x25   :  { %264 = vsyncadd [#allocation4], 4294967040 }
  0x26   :  { %265 = dma.done.wait [#allocation7], 256  }
  0x27   :  { %266 = vsyncadd [#allocation7], 4294967040  ;;  %v275_v0 = vmov 0.0   ;;  %vm276_vm0 = vmmov 0   ;;  %v195_v1 = vld [vmem:[#allocation6] sm:$0xff]   ;;  %v196_v2 = vld [vmem:[#allocation6 + $0x8] sm:$0xff]  }
  0x28   :  { %178 = vmatprep.subr.bf16.mxu0 %v275_v0  ;;  %182 = vmatprep.mubr.msk.bf16.mxu0 %vm276_vm0, %v275_v0  ;;  %v52_v3 = vld [vmem:[#allocation3] sm:$0xff]  ;;  %v53_v4 = vld [vmem:[#allocation3 + $0x8] sm:$0xff]  ;;  %vm71_vm1 = vcmask 261120   ;;  %s277_s13 = smov [#allocation8]  }
  0x29   :  { %179 = vmatpush3.bf16.msra.mxu0 %v195_v1  ;;  %v54_v5 = vpack.c.bf16 %v53_v4, %v52_v3  ;;  %v165_v7 = vld [vmem:[%s345_s2] ss:$0 sm:$0xff]  ;;  %s149_s14 = sshll.u32 %s277_s13, 4  ;;  %s150_s14 = int_to_ptr.vmem [resolvable:$true] %s149_s14 }
  0x2a   :  { %180 = vmatprep.subr.bf16.mxu0 %v275_v0  ;;  %s241_s15 = scalar_lea.vmem %s150_s14, 128  ;;  %p246_p3 = scmp.lt.s32.totalorder %s150_s14, %s150_s14 }
  0x2b   :  { %p242_p2 = scmp.ne.s32.totalorder %s150_s14, %s241_s15  ;;  %p247_p4 = scmp.lt.s32.totalorder %s241_s15, %s241_s15 }
  0x2d   :  { %181 = vmatpush3.bf16.msra.mxu0 %v196_v2  ;;  %p248_p5 = por %p247_p4, %p246_p3 }
  0x2f   :  { %p249_p6 = pnand %p248_p5, %p242_p2 }
  0x30   :  { %183 = vmatmul.mubr.msk.bf16.vlgmr.msra.gmra.mrb[0].mxu0 %vm71_vm1, %v54_v5 }
 0x103   :  { %v109_v6 = vpop.f32.mrb[0].mxu0 }
 0x104   :  { %v184_v8 = vpop.f32.mrb[1].mxu0  ;;  %v132_v10 = vadd.f32 %v165_v7, %v109_v6 }
 0x105   :  { %v112_v9 = vpop.f32.mrb[2].mxu0 }
 0x106   :  { %v133_v11 = vadd.f32 %v165_v7, %v112_v9  ;;  %v185_v12 = vpop.f32.mrb[3].mxu0 }
 0x108   :  { %v173_v13 = vpack.c.bf16 %v133_v11, %v132_v10 }
 0x10a   :  { %174 = vst [vmem:[#allocation8] sm:$0xff] %v173_v13  }
 0x10b   :  { %252 = shalt.err (!%p249_p6)
}
 0x10c   :  { %s253_s2 = scalar_lea.hbm %s346_s3, 128 }
 0x10d   :  { %p254_p7 = scmp.ne.s32.totalorder %s346_s3, %s253_s2  ;;  %p257_p8 = scmp.lt.u32.totalorder %s253_s2, %s346_s3 }
 0x10f   :  { %p259_p9 = pnand %p257_p8, %p254_p7 }
 0x111   :  { %262 = shalt.err (!%p259_p9)
}
 0x112   :  { %155 = dma.vmem_to_hbm [thread:$0]  %s150_s14, 128, %s346_s3, [#allocation5], %s273_s0, %s273_s0, %s274_s9  }
 0x113   :  { %267 = dma.done.wait [#allocation5], 128  }
 0x114   :  { %268 = vsyncadd [#allocation5], 4294967168 }
 0x115   :  { %159 = vsyncpa [#allocation4], 1 }
 0x116   :  { %160 = vsyncpa [#allocation7], 1 }
 0x117   :  { %161 = vsyncpa [#allocation5], 1 }

</bundles_post_ra>
